<compile_context>
chip_gen: v5e
topology: v5e:2x2
jax: 0.10.0
libtpu: 0.0.40
codegen_flags: <defaults>
</compile_context>

<pallas_src>
import jax
import jax.numpy as jnp
from jax.experimental import pallas as pl
from jax.experimental.pallas import tpu as pltpu

_LANE = 128
_TARGET_TILE_BYTES = 2 << 20   # 2 MiB per (1, TM, 128) tile


def _droppath_kernel(scale_ref, keep_ref, x_ref, o_ref):
    # scale_ref: SMEM (B,) f32 = floor(keep_prob + U[0,1)) / keep_prob.
    # keep_ref:  SMEM (B,) i32 = 1 keep sample, 0 drop sample.
    # x_ref / o_ref: VMEM tiles (1, TM, 128) of the flattened sample.
    b = pl.program_id(0)
    keep = keep_ref[b]

    @pl.when(keep == 0)
    def _():
        # Input tile for this sample was never (re-)fetched; write explicit
        # zeros instead of multiplying possibly-stale VMEM contents by 0.
        o_ref[...] = jnp.zeros_like(o_ref)

    @pl.when(keep != 0)
    def _():
        # f32 multiply, single cast to the output dtype.
        o_ref[...] = (x_ref[...] * scale_ref[b]).astype(o_ref.dtype)


def drop_path(x, key, drop_prob=0.0, training=True):
    """Stochastic depth per sample. x: (B, ...) e.g. (B, C, H, W)."""
    # NOTE: static (Python-level) config branch, matching the nn.Module.
    if drop_prob == 0.0 or not training:
        return x
    keep_prob = 1.0 - drop_prob
    B = x.shape[0]
    orig_shape = x.shape
    orig_dtype = x.dtype

    # Per-sample keep mask + scale: B scalars of glue, prefetched into SMEM.
    rand = jax.random.uniform(key, (B,), dtype=jnp.float32)
    mask_f = jnp.floor(keep_prob + rand)                  # {0.0, 1.0}
    scale = (mask_f / keep_prob).astype(jnp.float32)      # {0, 1/keep_prob}
    keep = mask_f.astype(jnp.int32)                       # {0, 1}

    n = 1
    for d in orig_shape[1:]:
        n *= d
    x_flat = x.reshape(B, n)

    m_rows = n // _LANE            # lane-aligned bulk rows
    n_bulk = m_rows * _LANE

    if m_rows == 0:
        # Entire sample is smaller than one lane vector; plain JAX.
        out = (x_flat * scale[:, None]).astype(orig_dtype)
        return out.reshape(orig_shape)

    # Lane-dense view of the bulk: (B, m_rows, 128). Zero-copy when n_bulk==n.
    x3 = x_flat[:, :n_bulk].reshape(B, m_rows, _LANE)

    # Tile size chosen in bytes, rounded down to the dtype's sublane multiple.
    itemsize = jnp.dtype(orig_dtype).itemsize
    sublane = max(8, 32 // itemsize)                      # 8 / 16 / 32
    tm_cap = max(sublane,
                 (_TARGET_TILE_BYTES // (_LANE * itemsize)) // sublane * sublane)
    tm = m_rows if m_rows <= tm_cap else tm_cap
    grid_m = pl.cdiv(m_rows, tm)
    block_shape = (1, tm, _LANE)

    # Input tiles of dropped samples all resolve to block (b, 0, 0), so their
    # DMA is issued once and elided on subsequent sequential steps; the m axis
    # is "arbitrary" to guarantee sequential revisit order, the batch axis is
    # "parallel" for megacore sharding.
    def x_map(b, m, scale_ref, keep_ref):
        return (b, m * keep_ref[b], 0)

    def o_map(b, m, scale_ref, keep_ref):
        return (b, m, 0)

    out3 = pl.pallas_call(
        _droppath_kernel,
        out_shape=jax.ShapeDtypeStruct((B, m_rows, _LANE), orig_dtype),
        grid_spec=pltpu.PrefetchScalarGridSpec(
            num_scalar_prefetch=2,
            grid=(B, grid_m),
            in_specs=[pl.BlockSpec(block_shape, x_map)],
            out_specs=pl.BlockSpec(block_shape, o_map),
        ),
        compiler_params=pltpu.CompilerParams(
            dimension_semantics=("parallel", "arbitrary"),
        ),
    )(scale, keep, x3)
    # TODO(synk): optionally pass input_output_aliases to alias x3 -> out when
    # the caller can donate x (same HBM traffic, halves peak HBM footprint).

    out_bulk = out3.reshape(B, n_bulk)
    if n_bulk == n:
        return out_bulk.reshape(orig_shape)

    # Ragged (< 128-element) per-sample tail: negligible work, plain JAX.
    tail = x_flat[:, n_bulk:]
    out_tail = (tail * scale[:, None]).astype(orig_dtype)
    out = jnp.concatenate([out_bulk, out_tail], axis=1)
    return out.reshape(orig_shape)


if __name__ == "__main__":
    key = jax.random.PRNGKey(0)
    kx, kr = jax.random.split(key)

    B, C, H, W = 2, 4, 16, 16
    x = jax.random.normal(kx, (B, C, H, W), dtype=jnp.float32)
    drop_prob = 0.3
    keep_prob = 1.0 - drop_prob

    out = jax.block_until_ready(drop_path(x, kr, drop_prob=drop_prob, training=True))

    # Reference check (same randoms, plain JAX, PyTorch-style math).
    rand = jax.random.uniform(kr, (B,), dtype=jnp.float32)
    mask = jnp.floor(keep_prob + rand).reshape(B, 1, 1, 1)
    ref = x / keep_prob * mask
    assert out.shape == x.shape and out.dtype == x.dtype
    assert jnp.allclose(out, ref, rtol=1e-6, atol=1e-6)

    # High drop probability: exercises the dropped-sample (zero-write / DMA-skip)
    # path with near-certainty; the check is valid for any realized mask.
    k2x, k2r = jax.random.split(jax.random.PRNGKey(1))
    x2 = jax.random.normal(k2x, (4, 4, 16, 16), dtype=jnp.float32)
    dp2 = 0.9
    out2 = jax.block_until_ready(drop_path(x2, k2r, drop_prob=dp2, training=True))
    rand2 = jax.random.uniform(k2r, (4,), dtype=jnp.float32)
    mask2 = jnp.floor((1.0 - dp2) + rand2).reshape(4, 1, 1, 1)
    ref2 = x2 / (1.0 - dp2) * mask2
    assert jnp.allclose(out2, ref2, rtol=1e-5, atol=1e-5)

    # Ragged feature size (n % 128 != 0): kernel on the aligned bulk + JAX tail.
    k3x, k3r = jax.random.split(jax.random.PRNGKey(2))
    x3 = jax.random.normal(k3x, (2, 3, 7, 9), dtype=jnp.float32)   # n = 189
    out3 = jax.block_until_ready(drop_path(x3, k3r, drop_prob=drop_prob, training=True))
    rand3 = jax.random.uniform(k3r, (2,), dtype=jnp.float32)
    mask3 = jnp.floor(keep_prob + rand3).reshape(2, 1, 1, 1)
    ref3 = x3 / keep_prob * mask3
    assert jnp.allclose(out3, ref3, rtol=1e-6, atol=1e-6)

    # Eval / drop_prob==0 paths return the input unchanged.
    assert jnp.array_equal(
        jax.block_until_ready(drop_path(x, kr, drop_prob=drop_prob, training=False)), x)
    assert jnp.array_equal(
        jax.block_until_ready(drop_path(x, kr, drop_prob=0.0, training=True)), x)

    print("KERNEL_OK")
</pallas_src>

<mosaic_0001>
module attributes {stable_mosaic.version = 11 : i64} {
  func.func @_droppath_kernel(%arg0: i32, %arg1: i32, %arg2: memref<2xf32, #tpu.memory_space<smem>>, %arg3: memref<2xi32, #tpu.memory_space<smem>>, %arg4: memref<1x8x128xf32, #tpu.memory_space<vmem>>, %arg5: memref<1x8x128xf32, #tpu.memory_space<vmem>>) attributes {dimension_semantics = [#tpu.dimension_semantics<parallel>, #tpu.dimension_semantics<arbitrary>], iteration_bounds = array<i64: 2, 1>, scalar_prefetch = 2 : i64, scratch_operands = 0 : i64, tpu.core_type = #tpu.core_type<tc>, window_params = [{transform_indices = @transform_0, window_bounds = array<i64: 1, 8, 128>}, {transform_indices = @transform_1, window_bounds = array<i64: 1, 8, 128>}]} {
    %0 = arith.index_cast %arg0 : i32 to index
    %1 = memref.load %arg3[%0] : memref<2xi32, #tpu.memory_space<smem>>
    %c0_i32 = arith.constant 0 : i32
    %2 = arith.cmpi eq, %1, %c0_i32 : i32
    %3 = arith.extui %2 : i1 to i32
    %c0_i32_0 = arith.constant 0 : i32
    %4 = arith.cmpi ne, %3, %c0_i32_0 : i32
    scf.if %4 {
      %cst = arith.constant 0.000000e+00 : f32
      %8 = vector.broadcast %cst : f32 to vector<1x8x128xf32>
      %c0 = arith.constant 0 : index
      %c0_3 = arith.constant 0 : index
      %c0_4 = arith.constant 0 : index
      %9 = vector.load %arg5[%c0, %c0_3, %c0_4] : memref<1x8x128xf32, #tpu.memory_space<vmem>>, vector<1x8x128xf32>
      tpu.vector_store %arg5[%c0, %c0_3, %c0_4], %8 {strides = array<i32>} : memref<1x8x128xf32, #tpu.memory_space<vmem>>, vector<1x8x128xf32>,
    } else {
    }
    %c0_i32_1 = arith.constant 0 : i32
    %5 = arith.cmpi ne, %1, %c0_i32_1 : i32
    %6 = arith.extui %5 : i1 to i32
    %c0_i32_2 = arith.constant 0 : i32
    %7 = arith.cmpi ne, %6, %c0_i32_2 : i32
    scf.if %7 {
      %c0 = arith.constant 0 : index
      %c0_3 = arith.constant 0 : index
      %c0_4 = arith.constant 0 : index
      %8 = vector.load %arg4[%c0, %c0_3, %c0_4] : memref<1x8x128xf32, #tpu.memory_space<vmem>>, vector<1x8x128xf32>
      %9 = arith.index_cast %arg0 : i32 to index
      %10 = memref.load %arg2[%9] : memref<2xf32, #tpu.memory_space<smem>>
      %11 = vector.broadcast %10 : f32 to vector<1x8x128xf32>
      %12 = arith.mulf %8, %11 : vector<1x8x128xf32>
      %c0_5 = arith.constant 0 : index
      %c0_6 = arith.constant 0 : index
      %c0_7 = arith.constant 0 : index
      %13 = vector.load %arg5[%c0_5, %c0_6, %c0_7] : memref<1x8x128xf32, #tpu.memory_space<vmem>>, vector<1x8x128xf32>
      tpu.vector_store %arg5[%c0_5, %c0_6, %c0_7], %12 {strides = array<i32>} : memref<1x8x128xf32, #tpu.memory_space<vmem>>, vector<1x8x128xf32>,
    } else {
    }
    return
  }
  func.func @transform_0(%arg0: i32, %arg1: i32, %arg2: memref<2xf32, #tpu.memory_space<smem>>, %arg3: memref<2xi32, #tpu.memory_space<smem>>) -> (i32, i32, i32) {
    %0 = arith.index_cast %arg0 : i32 to index
    %1 = memref.load %arg3[%0] : memref<2xi32, #tpu.memory_space<smem>>
    %2 = arith.muli %arg1, %1 : i32
    %c0_i32 = arith.constant 0 : i32
    %c0_i32_0 = arith.constant 0 : i32
    return %arg0, %2, %c0_i32 : i32, i32, i32
  }
  func.func @transform_1(%arg0: i32, %arg1: i32, %arg2: memref<2xf32, #tpu.memory_space<smem>>, %arg3: memref<2xi32, #tpu.memory_space<smem>>) -> (i32, i32, i32) {
    %c0_i32 = arith.constant 0 : i32
    %c0_i32_0 = arith.constant 0 : i32
    return %arg0, %arg1, %c0_i32 : i32, i32, i32
  }
}

</mosaic_0001>

<bundles_post_ra>
// kernel: tpu_custom_call.1
= control target key start
LH: loop header
LB: loop body
LE: loop exit
PB: predicated region body
PF: predicated region fallthrough
CT: control target
= control target key end

     0   :  { %s506_s18 = smov [#allocation3]   ;;  %s507_s19 = smov [#allocation4]   ;;  %s657_s0 = inlined_call_operand.hbm [shape: f32[2], index: 0, kind: input, shape index: {}]   ;;  %s658_s2 = inlined_call_operand.hbm [shape: f32[2,8,128], index: 2, kind: input, shape index: {}]   ;;  %s659_s3 = inlined_call_operand.hbm [shape: f32[2,8,128], index: 3, kind: output, shape index: {}]   ;;  %s660_s1 = inlined_call_operand.hbm [shape: s32[2], index: 1, kind: input, shape index: {}]  }
   0x1   :  { %s9_s14 = sshll.u32 %s657_s0, 4  ;;  %s14_s17 = sshll.u32 %s660_s1, 4  ;;  %s10_s14 = int_to_ptr.hbm [resolvable:$true] %s9_s14  ;;  %s15_s17 = int_to_ptr.hbm [resolvable:$true] %s14_s17 }
   0x2   :  { %12 = dma.hbm_to_smem %s10_s14, 16, %s506_s18, [#allocation2] }
   0x3   :  { %17 = dma.hbm_to_smem %s15_s17, 16, %s507_s19, [#allocation2] }
   0x4   :  { %472 = dma.done.wait [#allocation2], 32 }
   0x5   :  { %473 = vsyncadd [#allocation2], 4294967264 }
   0x6   :  { %20 = sfence }
   0x7   :  { %21 = vsyncpa [#allocation6], 0 }
   0x8   :  { %23 = vsyncpa [#allocation6 + $0x1], 0 }
   0x9   :  { %24 = vsyncpa [#allocation7], 0 }
   0xa   :  { %26 = vsyncpa [#allocation7 + $0x1], 0  ;;  %s535_s20 = smov 0   ;;  %s537_s0 = smov 0  }
   0xb   :  { %s539_s21 = smov 0   ;;  %s541_s1 = smov 0  }
   0xc   :  { %s543_s22 = smov 0   ;;  %s545_s23 = smov 0  }
   0xd LB: > { %s286_s24 = sadd.s32 4294967295, %s504_s23   ;;  %s287_s25 = sadd.s32 4294967294, %s504_s23   ;;  %s504_s23 = sphi %s545_s23, %s32_s23   ;;  %s500_s22 = sphi %s543_s22, %s669_s22   ;;  %s496_s1 = sphi %s541_s1, %s668_s1   ;;  %s492_s21 = sphi %s539_s21, %s667_s21   ;;  %s488_s0 = sphi %s537_s0, %s666_s0   ;;  %s484_s20 = sphi %s535_s20, %s665_s20  }
   0xe   : > { %s44_s26 = sadd.s32 1, %s500_s22  ;;  %s57_s27 = sadd.s32 1, %s492_s21 }
   0xf   : > { %p46_p0 = scmp.ge.s32.totalorder %s44_s26, 2  ;;  %p64_p1 = scmp.ne.s32.totalorder %s492_s21, %s488_s0 }
  0x10   : > { %p65_p2 = scmp.eq.s32.totalorder %s504_s23, 0  ;;  %p70_p3 = scmp.ne.s32.totalorder %s488_s0, %s484_s20 }
  0x11   : > { %s671_s26 = smov (%p46_p0, %s44_s26), 0  ;;  %p71_p5 = scmp.eq.s32.totalorder %s286_s24, 0 }
  0x12   : > { %p576_p4 = por %p65_p2, %p64_p1  ;;  %s52_s29 = ssub.s32 %s500_s22, %s671_s26 }
  0x13   : > { %p96_p6 = scmp.eq.s32.totalorder %s286_s24, 1  ;;  %p55_p7 = scmp.eq.s32.totalorder %s52_s29, 0 }
  0x14   : > { %p582_p8 = por %p71_p5, %p70_p3  ;;  %p102_p10 = scmp.eq.s32.totalorder %s287_s25, 1 }
  0x15   : > { %p586_p9 = por %p96_p6, %p64_p1  ;;  %p289_p12 = scmp.ge.s32.totalorder %s504_s23, 2 }
  0x16   : > { %s591_s5 = scalar_select %p55_p7, %s492_s21, %s57_s27  }
  0x17   : > { %p593_p11 = por %p102_p10, %p70_p3  ;;  %p313_p13 = scmp.lt.s32.totalorder %s504_s23, 2 }
  0x18   : > { %s122_s7 = sand.u32 1, %s492_s21   ;;  %s291_s9 = sshll.u32 %s500_s22, 3 }
  0x19   : > { %s290_s8 = sshll.u32 %s122_s7, 3  ;;  %s133_s12 = scalar_lea.hbm %s658_s2, %s291_s9 }
  0x1a   : > { %s126_s13 = scalar_lea.vmem [#allocation5], %s290_s8  ;;  %s135_s15 = sshll.u32 %s133_s12, 4  ;;  %s136_s15 = int_to_ptr.hbm [resolvable:$true] %s135_s15 }
  0x1b   : > { %s137_s14 = sshll.u32 %s126_s13, 4  ;;  %p306_p0 = pnand %p313_p13, %p576_p4  ;;  %s138_s14 = int_to_ptr.vmem [resolvable:$true] %s137_s14 }
  0x1c   : > { %p292_p1 = scmp.ge.s32.totalorder %s504_s23, 1  ;;  %p142_p2 = scmp.lt.s32.totalorder %s504_s23, 3 }
  0x1d   : > { %s123_s16 = scalar_lea.sflag [#allocation6], %s122_s7 }
  0x1e   : > { %308 = dma.hbm_to_vmem [thread:$0]  (!%p306_p0), %s136_s15, 128, %s138_s14, %s123_s16  }
  0x1f   : > { %p143_p3 = pnand %p292_p1, %p142_p2 }
  0x20   : > { %s609_s17 = sand.u32 (!%p143_p3), 1, %s488_s0  }
  0x21   : > { %146 = sbr.rel (%p143_p3) target bundleno = 80 (0x50), region = 24  ;;  %s293_s18 = sshll.u32 (!%p143_p3), %s609_s17, 3 }
  0x22   : > { %s149_s19 = scalar_lea.sflag (!%p143_p3), [#allocation6], %s609_s17  ;;  %s152_s24 = scalar_lea.vmem (!%p143_p3), [#allocation5], %s293_s18 }
  0x26   : > { %475 = dma.done.wait (%p582_p8), %s149_s19, 128  }
  0x27   : > { %477 = vsyncadd (%p582_p8), %s149_s19, 4294967168  ;;  %s174_s25 = sld [smem:[#allocation4 + %s496_s1]]  ;;  %s171_s27 = scalar_lea.vmem [#allocation8], %s293_s18 }
  0x2d   : > { %p295_p4 = scmp.ne.s32.totalorder %s174_s25, 0 }
  0x2f   : > { %178 = sbr.rel (%p295_p4) target bundleno = 54 (0x36), region = 32 }
  0x34   : > { %v508_v0 = vmov 0.0  }
  0x35   : > { %179 = vst [vmem:[%s171_s27] sm:$0xff] %v508_v0 }
  0x36 PF: > { %p296_p5 = scmp.eq.s32.totalorder %s174_s25, 0 }
  0x37   : > { %s185_s28 = sld [smem:[#allocation3 + %s496_s1]] (!%p296_p5) }
  0x38   : > { %183 = sbr.rel (%p296_p5) target bundleno = 65 (0x41), region = 36 }
  0x3d   : > { %v184_v1 = vld [vmem:[%s152_s24] sm:$0xff]  ;;  %v186_v2 = vstv %s185_s28 }
  0x3e   : > { %v187_v3 = vmul.f32 %v186_v2, %v184_v1 }
  0x40   : > { %188 = vst [vmem:[%s171_s27] sm:$0xff] %v187_v3 }
  0x41 PF: > { %s298_s29 = sshll.u32 %s496_s1, 3  ;;  %s203_s9 = sshll.u32 %s171_s27, 4  ;;  %s204_s9 = int_to_ptr.vmem [resolvable:$true] %s203_s9 }
  0x42   : > { %s201_s8 = scalar_lea.hbm %s659_s3, %s298_s29  ;;  %s190_s11 = scalar_lea.sflag [#allocation7], %s609_s17 }
  0x43   : > { %s205_s10 = sshll.u32 %s201_s8, 4  ;;  %s440_s1 = scalar_lea.hbm %s659_s3, 16  ;;  %s206_s10 = int_to_ptr.hbm [resolvable:$true] %s205_s10 }
  0x44   : > { %s434_s12 = sshra.s32 %s206_s10, 4  ;;  %s435_s12 = int_to_ptr.hbm [resolvable:$true] %s434_s12 }
  0x45   : > { %s436_s13 = scalar_lea.hbm %s435_s12, 8  ;;  %p441_p10 = scmp.lt.s32.totalorder %s435_s12, %s659_s3 }
  0x46   : > { %p437_p6 = scmp.ne.s32.totalorder %s435_s12, %s436_s13  ;;  %p442_p13 = scmp.lt.s32.totalorder %s440_s1, %s436_s13 }
  0x48   : > { %p438_p7 = pnand %p437_p6, %p586_p9  ;;  %p443_p0 = por %p442_p13, %p441_p10 }
  0x4a   : > { %p439_p8 = pneg %p438_p7 }
  0x4c   : > { %p444_p1 = pnand %p443_p0, %p439_p8 }
  0x4e   : > { %447 = shalt.err (!%p444_p1)
}
  0x4f   : > { %303 = dma.vmem_to_hbm [thread:$0]  (%p586_p9), %s204_s9, 128, %s206_s10, %s190_s11  }
  0x50 PF: > { %s217_s17 = sand.u32 1, %s484_s20   ;;  %p310_p2 = pnand %p289_p12, %p593_p11 }
  0x51   : > { %s218_s19 = scalar_lea.sflag [#allocation7], %s217_s17 }
  0x52   : > { %p311_p3 = pneg %p310_p2 }
  0x54   : > { %479 = dma.done.wait (%p311_p3), %s218_s19, 128  }
  0x55   : > { %481 = vsyncadd (%p311_p3), %s218_s19, 4294967168  ;;  %s32_s23 = sadd.s32 1, %s504_s23   ;;  %s665_s20 = smov %s488_s0 }
  0x56   : > { %p29_p4 = scmp.ge.s32.totalorder %s32_s23, 4   ;;  %s666_s0 = smov %s492_s21 }
  0x57   : > { %s667_s21 = smov %s591_s5  ;;  %s668_s1 = smov %s500_s22 }
  0x58   : > { %s669_s22 = smov %s671_s26  ;;  %31 = sbr.rel (!%p29_p4) target bundleno = 13 (0xd), region = 77 }
  0x5d   :  { %224 = vsyncpa [#allocation6], 1 }
  0x5e   :  { %226 = vsyncpa [#allocation6 + $0x1], 1 }
  0x5f   :  { %227 = vsyncpa [#allocation7], 1 }
  0x60   :  { %229 = vsyncpa [#allocation7 + $0x1], 1 }

</bundles_post_ra>
